<compile_context>
chip_gen: v5e
topology: v5e:2x2
jax: 0.10.0
libtpu: 0.0.40
codegen_flags: <defaults>
</compile_context>

<pallas_src>
import math

import jax
import jax.numpy as jnp
from jax.experimental import pallas as pl
from jax.experimental.pallas import tpu as pltpu


def _round_up(n, m):
    return ((n + m - 1) // m) * m


def _encoder_kernel(x_ref,
                    w1_ref, b1_ref,
                    w2_ref, b2_ref,
                    w3_ref, b3_ref,
                    wh_ref, bh_ref,
                    out_ref):
    """One (TB, input_size) batch tile -> (TB, 2*latent) fused-head output.

    Matmuls run with bf16 operands on the MXU, accumulating in f32; bias adds
    and ReLUs run in f32 on the VPU. x is cast to bf16 in-register here (free
    under MXU/DMA slack) instead of in a separate XLA op over HBM.
    """
    x = x_ref[...].astype(w1_ref.dtype)                               # f32 -> bf16

    h = jnp.dot(x, w1_ref[...], preferred_element_type=jnp.float32) + b1_ref[...]
    h = jnp.maximum(h, 0.0).astype(w2_ref.dtype)

    h = jnp.dot(h, w2_ref[...], preferred_element_type=jnp.float32) + b2_ref[...]
    h = jnp.maximum(h, 0.0).astype(w3_ref.dtype)

    h = jnp.dot(h, w3_ref[...], preferred_element_type=jnp.float32) + b3_ref[...]
    h = jnp.maximum(h, 0.0).astype(wh_ref.dtype)

    # Fused mean|rho head: one 128-lane matmul, one lane-dense store.
    out = jnp.dot(h, wh_ref[...], preferred_element_type=jnp.float32) + bh_ref[...]
    out_ref[...] = out.astype(out_ref.dtype)


def init_encoder_params(key, input_size, hidden_size, latent_size,
                        dtype=jnp.float32):
    """Matches the torch module's _init_weights (kaiming / xavier normal).

    Weights are returned already transposed to (in, out). Biases are zero.
    """
    k1, k2, k3, k4, k5 = jax.random.split(key, 5)

    def kaiming(k, fan_in, fan_out):
        std = math.sqrt(2.0 / fan_in)
        w = jax.random.normal(k, (fan_out, fan_in), dtype) * std   # torch shape
        return w.T

    def xavier(k, fan_in, fan_out):
        std = math.sqrt(2.0 / (fan_in + fan_out))
        w = jax.random.normal(k, (fan_out, fan_in), dtype) * std
        return w.T

    return {
        "w1": kaiming(k1, input_size, hidden_size),
        "b1": jnp.zeros((1, hidden_size), dtype),
        "w2": kaiming(k2, hidden_size, hidden_size),
        "b2": jnp.zeros((1, hidden_size), dtype),
        "w3": kaiming(k3, hidden_size, hidden_size),
        "b3": jnp.zeros((1, hidden_size), dtype),
        "wm": xavier(k4, hidden_size, latent_size),
        "bm": jnp.zeros((1, latent_size), dtype),
        "wr": xavier(k5, hidden_size, latent_size),
        "br": jnp.zeros((1, latent_size), dtype),
    }


def prepare_kernel_params(params, compute_dtype=jnp.bfloat16):
    """One-time packing/casting: fuse mean|rho head, cast weights to bf16."""
    return {
        "w1": params["w1"].astype(compute_dtype),
        "b1": params["b1"].astype(jnp.float32),
        "w2": params["w2"].astype(compute_dtype),
        "b2": params["b2"].astype(jnp.float32),
        "w3": params["w3"].astype(compute_dtype),
        "b3": params["b3"].astype(jnp.float32),
        "wh": jnp.concatenate([params["wm"], params["wr"]], axis=1
                              ).astype(compute_dtype),
        "bh": jnp.concatenate([params["bm"], params["br"]], axis=1
                              ).astype(jnp.float32),
    }


def _batch_semantics(num_steps):
    """v7x has 2 TensorCores sharing HBM: shard batch tiles across both via
    CORE_PARALLEL.  Single-TC generations (v5e/v6e) keep plain 'parallel'
    (measured as equivalent to 'arbitrary', but harmless)."""
    try:
        kind = jax.devices()[0].device_kind.lower()
    except Exception:  # pragma: no cover - defensive only
        kind = ""
    if "v7" in kind and num_steps >= 2:
        return (pltpu.CORE_PARALLEL,)
    return ("parallel",)


def encoder_forward(x, kparams, input_size, *, block_rows=1024):
    """Pallas-backed forward: returns (z_mean, z_rho) in f32."""
    if x.ndim > 2:
        x = x.reshape(-1, input_size)        # same as torch x.view(-1, input_size)

    B = x.shape[0]
    hidden = kparams["w1"].shape[1]
    two_lat = kparams["wh"].shape[1]
    latent = two_lat // 2

    if B == 0:                               # degenerate batch: nothing to do
        z = jnp.zeros((0, latent), jnp.float32)
        return z, z

    # Batch tile: default 1024 rows (multiple of 256 -> fills the 256-row MXU
    # M dim on v6e/v7x, amortizes ~0.35us/step pipeline overhead); rounded up
    # to a multiple of 16 so bf16 activations keep packed sublane layouts.
    # No host-side padding: the ragged last tile is masked by Pallas, and row
    # independence means padded rows cannot contaminate valid outputs.
    tb = min(block_rows, _round_up(max(B, 16), 16))
    grid = (pl.cdiv(B, tb),)

    def const_map(i):
        return (0, 0)

    in_specs = [
        pl.BlockSpec((tb, input_size), lambda i: (i, 0)),            # x tile
        pl.BlockSpec(kparams["w1"].shape, const_map),
        pl.BlockSpec(kparams["b1"].shape, const_map),
        pl.BlockSpec(kparams["w2"].shape, const_map),
        pl.BlockSpec(kparams["b2"].shape, const_map),
        pl.BlockSpec(kparams["w3"].shape, const_map),
        pl.BlockSpec(kparams["b3"].shape, const_map),
        pl.BlockSpec(kparams["wh"].shape, const_map),
        pl.BlockSpec(kparams["bh"].shape, const_map),
    ]
    out_spec = pl.BlockSpec((tb, two_lat), lambda i: (i, 0))

    flops = 2 * B * (input_size * hidden + 2 * hidden * hidden
                     + hidden * two_lat)
    bytes_accessed = int(
        int(x.size) * x.dtype.itemsize                               # x at true dtype
        + sum(int(v.size) * v.dtype.itemsize for v in kparams.values())
        + B * two_lat * 4                                            # f32 output
    )
    cost = pl.CostEstimate(flops=flops, transcendentals=0,
                           bytes_accessed=bytes_accessed)

    out = pl.pallas_call(
        _encoder_kernel,
        out_shape=jax.ShapeDtypeStruct((B, two_lat), jnp.float32),
        grid=grid,
        in_specs=in_specs,
        out_specs=out_spec,
        compiler_params=pltpu.CompilerParams(
            dimension_semantics=_batch_semantics(grid[0]),
            vmem_limit_bytes=32 * 1024 * 1024,
        ),
        cost_estimate=cost,
    )(
        x,
        kparams["w1"], kparams["b1"],
        kparams["w2"], kparams["b2"],
        kparams["w3"], kparams["b3"],
        kparams["wh"], kparams["bh"],
    )

    return out[:, :latent], out[:, latent:]


def encoder_forward_ref(x, params, input_size):
    """Pure-JAX reference mirroring the kernel's bf16-operand/f32-acc math."""
    if x.ndim > 2:
        x = x.reshape(-1, input_size)
    bf = jnp.bfloat16

    def lin(h, w, b):
        return jnp.dot(h.astype(bf), w.astype(bf),
                       preferred_element_type=jnp.float32) + b

    h = jnp.maximum(lin(x, params["w1"], params["b1"]), 0.0)
    h = jnp.maximum(lin(h, params["w2"], params["b2"]), 0.0)
    h = jnp.maximum(lin(h, params["w3"], params["b3"]), 0.0)
    z_mean = lin(h, params["wm"], params["bm"])
    z_rho = lin(h, params["wr"], params["br"])
    return z_mean, z_rho


if __name__ == "__main__":
    # Small, module-consistent sizes.
    input_size, hidden_size, latent_size = 256, 128, 64
    key = jax.random.PRNGKey(0)
    k_param, k_x = jax.random.split(key)

    params = init_encoder_params(k_param, input_size, hidden_size, latent_size)
    kparams = prepare_kernel_params(params)

    # x has >2 dims (image batch); forward flattens to (-1, input_size):
    # 2*4*16*16 = 2048 -> (8, 256).
    x = jax.random.normal(k_x, (2, 4, 16, 16), jnp.float32)

    z_mean, z_rho = encoder_forward(x, kparams, input_size)
    jax.block_until_ready((z_mean, z_rho))

    # Verify against the pure-JAX reference (bf16 operands -> relaxed tol).
    zm_ref, zr_ref = encoder_forward_ref(x, params, input_size)
    assert z_mean.shape == (8, latent_size) and z_rho.shape == (8, latent_size)
    assert jnp.allclose(z_mean, zm_ref, atol=1e-2, rtol=1e-2)
    assert jnp.allclose(z_rho, zr_ref, atol=1e-2, rtol=1e-2)

    print("KERNEL_OK")
</pallas_src>

<mosaic_0001>
module attributes {stable_mosaic.version = 11 : i64} {
  func.func @_encoder_kernel(%arg0: i32, %arg1: memref<16x256xf32, #tpu.memory_space<vmem>>, %arg2: memref<256x128xbf16, #tpu.memory_space<vmem>>, %arg3: memref<1x128xf32, #tpu.memory_space<vmem>>, %arg4: memref<128x128xbf16, #tpu.memory_space<vmem>>, %arg5: memref<1x128xf32, #tpu.memory_space<vmem>>, %arg6: memref<128x128xbf16, #tpu.memory_space<vmem>>, %arg7: memref<1x128xf32, #tpu.memory_space<vmem>>, %arg8: memref<128x128xbf16, #tpu.memory_space<vmem>>, %arg9: memref<1x128xf32, #tpu.memory_space<vmem>>, %arg10: memref<16x128xf32, #tpu.memory_space<vmem>>) attributes {dimension_semantics = [#tpu.dimension_semantics<parallel>], iteration_bounds = array<i64: 1>, scalar_prefetch = 0 : i64, scratch_operands = 0 : i64, tpu.core_type = #tpu.core_type<tc>, window_params = [{transform_indices = @transform_0, window_bounds = array<i64: 16, 256>}, {pipeline_mode = #tpu.pipeline_mode<synchronous>, transform_indices = @transform_1, window_bounds = array<i64: 256, 128>}, {pipeline_mode = #tpu.pipeline_mode<synchronous>, transform_indices = @transform_2, window_bounds = array<i64: 1, 128>}, {pipeline_mode = #tpu.pipeline_mode<synchronous>, transform_indices = @transform_3, window_bounds = array<i64: 128, 128>}, {pipeline_mode = #tpu.pipeline_mode<synchronous>, transform_indices = @transform_4, window_bounds = array<i64: 1, 128>}, {pipeline_mode = #tpu.pipeline_mode<synchronous>, transform_indices = @transform_5, window_bounds = array<i64: 128, 128>}, {pipeline_mode = #tpu.pipeline_mode<synchronous>, transform_indices = @transform_6, window_bounds = array<i64: 1, 128>}, {pipeline_mode = #tpu.pipeline_mode<synchronous>, transform_indices = @transform_7, window_bounds = array<i64: 128, 128>}, {pipeline_mode = #tpu.pipeline_mode<synchronous>, transform_indices = @transform_8, window_bounds = array<i64: 1, 128>}, {transform_indices = @transform_9, window_bounds = array<i64: 16, 128>}]} {
    %c0 = arith.constant 0 : index
    %c0_0 = arith.constant 0 : index
    %0 = vector.load %arg1[%c0, %c0_0] : memref<16x256xf32, #tpu.memory_space<vmem>>, vector<16x256xf32>
    %1 = arith.truncf %0 : vector<16x256xf32> to vector<16x256xbf16>
    %c0_1 = arith.constant 0 : index
    %c0_2 = arith.constant 0 : index
    %2 = vector.load %arg2[%c0_1, %c0_2] : memref<256x128xbf16, #tpu.memory_space<vmem>>, vector<256x128xbf16>
    %cst = arith.constant dense<0.000000e+00> : vector<16x128xf32>
    %3 = tpu.matmul %1, %2, %cst {dimension_numbers = #tpu.dot_dimension_numbers<[1], [0], [0], [1], [0, 0, 1, 1], [], []>} : vector<16x256xbf16>, vector<256x128xbf16>, vector<16x128xf32> -> vector<16x128xf32>
    %c0_3 = arith.constant 0 : index
    %c0_4 = arith.constant 0 : index
    %4 = vector.load %arg3[%c0_3, %c0_4] : memref<1x128xf32, #tpu.memory_space<vmem>>, vector<1x128xf32>
    %5 = vector.broadcast %4 : vector<1x128xf32> to vector<16x128xf32>
    %6 = arith.addf %3, %5 : vector<16x128xf32>
    %cst_5 = arith.constant 0.000000e+00 : f32
    %7 = vector.broadcast %cst_5 : f32 to vector<16x128xf32>
    %8 = arith.maximumf %6, %7 : vector<16x128xf32>
    %9 = arith.truncf %8 : vector<16x128xf32> to vector<16x128xbf16>
    %c0_6 = arith.constant 0 : index
    %c0_7 = arith.constant 0 : index
    %10 = vector.load %arg4[%c0_6, %c0_7] : memref<128x128xbf16, #tpu.memory_space<vmem>>, vector<128x128xbf16>
    %cst_8 = arith.constant dense<0.000000e+00> : vector<16x128xf32>
    %11 = tpu.matmul %9, %10, %cst_8 {dimension_numbers = #tpu.dot_dimension_numbers<[1], [0], [0], [1], [0, 0, 1, 1], [], []>} : vector<16x128xbf16>, vector<128x128xbf16>, vector<16x128xf32> -> vector<16x128xf32>
    %c0_9 = arith.constant 0 : index
    %c0_10 = arith.constant 0 : index
    %12 = vector.load %arg5[%c0_9, %c0_10] : memref<1x128xf32, #tpu.memory_space<vmem>>, vector<1x128xf32>
    %13 = vector.broadcast %12 : vector<1x128xf32> to vector<16x128xf32>
    %14 = arith.addf %11, %13 : vector<16x128xf32>
    %cst_11 = arith.constant 0.000000e+00 : f32
    %15 = vector.broadcast %cst_11 : f32 to vector<16x128xf32>
    %16 = arith.maximumf %14, %15 : vector<16x128xf32>
    %17 = arith.truncf %16 : vector<16x128xf32> to vector<16x128xbf16>
    %c0_12 = arith.constant 0 : index
    %c0_13 = arith.constant 0 : index
    %18 = vector.load %arg6[%c0_12, %c0_13] : memref<128x128xbf16, #tpu.memory_space<vmem>>, vector<128x128xbf16>
    %cst_14 = arith.constant dense<0.000000e+00> : vector<16x128xf32>
    %19 = tpu.matmul %17, %18, %cst_14 {dimension_numbers = #tpu.dot_dimension_numbers<[1], [0], [0], [1], [0, 0, 1, 1], [], []>} : vector<16x128xbf16>, vector<128x128xbf16>, vector<16x128xf32> -> vector<16x128xf32>
    %c0_15 = arith.constant 0 : index
    %c0_16 = arith.constant 0 : index
    %20 = vector.load %arg7[%c0_15, %c0_16] : memref<1x128xf32, #tpu.memory_space<vmem>>, vector<1x128xf32>
    %21 = vector.broadcast %20 : vector<1x128xf32> to vector<16x128xf32>
    %22 = arith.addf %19, %21 : vector<16x128xf32>
    %cst_17 = arith.constant 0.000000e+00 : f32
    %23 = vector.broadcast %cst_17 : f32 to vector<16x128xf32>
    %24 = arith.maximumf %22, %23 : vector<16x128xf32>
    %25 = arith.truncf %24 : vector<16x128xf32> to vector<16x128xbf16>
    %c0_18 = arith.constant 0 : index
    %c0_19 = arith.constant 0 : index
    %26 = vector.load %arg8[%c0_18, %c0_19] : memref<128x128xbf16, #tpu.memory_space<vmem>>, vector<128x128xbf16>
    %cst_20 = arith.constant dense<0.000000e+00> : vector<16x128xf32>
    %27 = tpu.matmul %25, %26, %cst_20 {dimension_numbers = #tpu.dot_dimension_numbers<[1], [0], [0], [1], [0, 0, 1, 1], [], []>} : vector<16x128xbf16>, vector<128x128xbf16>, vector<16x128xf32> -> vector<16x128xf32>
    %c0_21 = arith.constant 0 : index
    %c0_22 = arith.constant 0 : index
    %28 = vector.load %arg9[%c0_21, %c0_22] : memref<1x128xf32, #tpu.memory_space<vmem>>, vector<1x128xf32>
    %29 = vector.broadcast %28 : vector<1x128xf32> to vector<16x128xf32>
    %30 = arith.addf %27, %29 : vector<16x128xf32>
    %c0_23 = arith.constant 0 : index
    %c0_24 = arith.constant 0 : index
    %31 = vector.load %arg10[%c0_23, %c0_24] : memref<16x128xf32, #tpu.memory_space<vmem>>, vector<16x128xf32>
    tpu.vector_store %arg10[%c0_23, %c0_24], %30 {strides = array<i32>} : memref<16x128xf32, #tpu.memory_space<vmem>>, vector<16x128xf32>,
    return
  }
  func.func @transform_0(%arg0: i32) -> (i32, i32) {
    %c0_i32 = arith.constant 0 : i32
    %c0_i32_0 = arith.constant 0 : i32
    return %arg0, %c0_i32 : i32, i32
  }
  func.func @transform_1(%arg0: i32) -> (i32, i32) {
    %c0_i32 = arith.constant 0 : i32
    %c0_i32_0 = arith.constant 0 : i32
    %c0_i32_1 = arith.constant 0 : i32
    return %c0_i32, %c0_i32_0 : i32, i32
  }
  func.func @transform_2(%arg0: i32) -> (i32, i32) {
    %c0_i32 = arith.constant 0 : i32
    %c0_i32_0 = arith.constant 0 : i32
    %c0_i32_1 = arith.constant 0 : i32
    return %c0_i32, %c0_i32_0 : i32, i32
  }
  func.func @transform_3(%arg0: i32) -> (i32, i32) {
    %c0_i32 = arith.constant 0 : i32
    %c0_i32_0 = arith.constant 0 : i32
    %c0_i32_1 = arith.constant 0 : i32
    return %c0_i32, %c0_i32_0 : i32, i32
  }
  func.func @transform_4(%arg0: i32) -> (i32, i32) {
    %c0_i32 = arith.constant 0 : i32
    %c0_i32_0 = arith.constant 0 : i32
    %c0_i32_1 = arith.constant 0 : i32
    return %c0_i32, %c0_i32_0 : i32, i32
  }
  func.func @transform_5(%arg0: i32) -> (i32, i32) {
    %c0_i32 = arith.constant 0 : i32
    %c0_i32_0 = arith.constant 0 : i32
    %c0_i32_1 = arith.constant 0 : i32
    return %c0_i32, %c0_i32_0 : i32, i32
  }
  func.func @transform_6(%arg0: i32) -> (i32, i32) {
    %c0_i32 = arith.constant 0 : i32
    %c0_i32_0 = arith.constant 0 : i32
    %c0_i32_1 = arith.constant 0 : i32
    return %c0_i32, %c0_i32_0 : i32, i32
  }
  func.func @transform_7(%arg0: i32) -> (i32, i32) {
    %c0_i32 = arith.constant 0 : i32
    %c0_i32_0 = arith.constant 0 : i32
    %c0_i32_1 = arith.constant 0 : i32
    return %c0_i32, %c0_i32_0 : i32, i32
  }
  func.func @transform_8(%arg0: i32) -> (i32, i32) {
    %c0_i32 = arith.constant 0 : i32
    %c0_i32_0 = arith.constant 0 : i32
    %c0_i32_1 = arith.constant 0 : i32
    return %c0_i32, %c0_i32_0 : i32, i32
  }
  func.func @transform_9(%arg0: i32) -> (i32, i32) {
    %c0_i32 = arith.constant 0 : i32
    %c0_i32_0 = arith.constant 0 : i32
    return %arg0, %c0_i32 : i32, i32
  }
}

</mosaic_0001>

<bundles_post_ra>
// kernel: tpu_custom_call.1
= control target key start
LH: loop header
LB: loop body
LE: loop exit
PB: predicated region body
PF: predicated region fallthrough
CT: control target
= control target key end

     0   :  { %14 = vsyncpa [#allocation3], 0  ;;  %s1027_s0 = inlined_call_operand.hbm [shape: f32[8,256], index: 0, kind: input, shape index: {}]   ;;  %s1028_s1 = inlined_call_operand.hbm [shape: bf16[256,128], index: 1, kind: input, shape index: {}]   ;;  %s1029_s2 = inlined_call_operand.vmem [shape: f32[1,128], index: 2, kind: input, shape index: {}]   ;;  %s1030_s3 = inlined_call_operand.hbm [shape: bf16[128,128], index: 3, kind: input, shape index: {}]   ;;  %s1031_s4 = inlined_call_operand.vmem [shape: f32[1,128], index: 4, kind: input, shape index: {}]   ;;  %s1032_s5 = inlined_call_operand.hbm [shape: bf16[128,128], index: 5, kind: input, shape index: {}]   ;;  %s1033_s6 = inlined_call_operand.vmem [shape: f32[1,128], index: 6, kind: input, shape index: {}]   ;;  %s1034_s7 = inlined_call_operand.hbm [shape: bf16[128,128], index: 7, kind: input, shape index: {}]   ;;  %s1035_s8 = inlined_call_operand.vmem [shape: f32[1,128], index: 8, kind: input, shape index: {}]   ;;  %s1036_s9 = inlined_call_operand.hbm [shape: f32[8,128], index: 9, kind: output, shape index: {}]  }
   0x1   :  { %15 = vsyncpa [#allocation6], 0 }
   0x2   :  { %16 = vsyncpa [#allocation9], 0 }
   0x3   :  { %17 = vsyncpa [#allocation4], 0  ;;  %s35_s11 = sshll.u32 %s1028_s1, 4  ;;  %s36_s11 = int_to_ptr.hbm [resolvable:$true] %s35_s11 }
   0x4   :  { %21 = vsyncadd [#allocation3], 256  ;;  %s923_s12 = smov [#allocation5]   ;;  %s65_s16 = sshll.u32 %s1032_s5, 4  ;;  %s66_s16 = int_to_ptr.hbm [resolvable:$true] %s65_s16 }
   0x5   :  { %s37_s13 = sshll.u32 %s923_s12, 4  ;;  %s924_s17 = smov 64   ;;  %s38_s13 = int_to_ptr.vmem [resolvable:$true] %s37_s13 }
   0x6   :  { %s925_s18 = smov 4   ;;  %s926_s19 = smov [#allocation8]  }
   0x7   :  { %43 = dma.hbm_to_vmem [thread:$0]  %s36_s11, 2048, %s38_s13, [#allocation6], %s924_s17, %s924_s17, %s925_s18  }
   0x8   :  { %s67_s20 = sshll.u32 %s926_s19, 4  ;;  %s22_s22 = sshll.u32 %s1027_s0, 4  ;;  %s68_s20 = int_to_ptr.vmem [resolvable:$true] %s67_s20  ;;  %s23_s22 = int_to_ptr.hbm [resolvable:$true] %s22_s22 }
   0x9   :  { %73 = dma.hbm_to_vmem [thread:$0]  %s66_s16, 1024, %s68_s20, [#allocation9], %s924_s17, %s924_s17, %s925_s18  }
   0xa   :  { %s927_s5 = smov [#allocation2]   ;;  %s50_s26 = sshll.u32 %s1030_s3, 4  ;;  %s51_s26 = int_to_ptr.hbm [resolvable:$true] %s50_s26 }
   0xb   :  { %s24_s23 = sshll.u32 %s927_s5, 4  ;;  %s928_s27 = smov 256   ;;  %s25_s23 = int_to_ptr.vmem [resolvable:$true] %s24_s23 }
   0xc   :  { %s929_s28 = smov 16   ;;  %s930_s29 = smov [#allocation7]  }
   0xd   :  { %30 = dma.hbm_to_vmem [thread:$0]  %s23_s22, 256, %s25_s23, [#allocation3], %s928_s27, %s928_s27, %s929_s28  }
   0xe   :  { %s52_s30 = sshll.u32 %s930_s29, 4  ;;  %s80_s11 = sshll.u32 %s1034_s7, 4  ;;  %s53_s30 = int_to_ptr.vmem [resolvable:$true] %s52_s30  ;;  %s81_s11 = int_to_ptr.hbm [resolvable:$true] %s80_s11 }
   0xf   :  { %58 = dma.hbm_to_vmem [thread:$0]  %s51_s26, 1024, %s53_s30, [#allocation6], %s924_s17, %s924_s17, %s925_s18  }
  0x10   :  { %s931_s12 = smov [#allocation10]  }
  0x11   :  { %s82_s13 = sshll.u32 %s931_s12, 4  ;;  %s83_s13 = int_to_ptr.vmem [resolvable:$true] %s82_s13 }
  0x12   :  { %88 = dma.hbm_to_vmem [thread:$0]  %s81_s11, 1024, %s83_s13, [#allocation9], %s924_s17, %s924_s17, %s925_s18  }
  0x13   :  { %915 = dma.done.wait [#allocation3], 512  }
  0x14   :  { %916 = vsyncadd [#allocation3], 4294966784 }
  0x15   :  { %917 = dma.done.wait [#allocation6], 3072  }
  0x16   :  { %918 = vsyncadd [#allocation6], 4294964224 }
  0x17   :  { %919 = dma.done.wait [#allocation9], 2048  }
  0x18   :  { %920 = vsyncadd [#allocation9], 4294965248  ;;  %v722_v0 = vld [vmem:[#allocation5 + $0x38] sm:$0xff]  ;;  %v721_v2 = vld [vmem:[#allocation5 + $0x30] sm:$0xff] }
  0x19   :  { %v730_v1 = vld [vmem:[#allocation5 + $0x78] sm:$0xff]  ;;  %249 = vmatpush.bf16.msra.mxu0 %v722_v0  ;;  %v729_v3 = vld [vmem:[#allocation5 + $0x70] sm:$0xff]  ;;  %v720_v4 = vld [vmem:[#allocation5 + $0x28] sm:$0xff] }
  0x1a   :  { %263 = vmatpush.bf16.msra.mxu1 %v730_v1  ;;  %v728_v5 = vld [vmem:[#allocation5 + $0x68] sm:$0xff]  ;;  %v738_v6 = vld [vmem:[#allocation7 + $0x38] sm:$0xff]  ;;  %v737_v7 = vld [vmem:[#allocation7 + $0x30] sm:$0xff] }
  0x1b   :  { %348 = vmatpush.bf16.msra.mxu2 %v738_v6  ;;  %v719_v8 = vld [vmem:[#allocation5 + $0x20] sm:$0xff]  ;;  %v736_v10 = vld [vmem:[#allocation7 + $0x28] sm:$0xff]  ;;  %v718_v11 = vld [vmem:[#allocation5 + $0x18] sm:$0xff] }
  0x1c   :  { %v727_v9 = vld [vmem:[#allocation5 + $0x60] sm:$0xff]  ;;  %v726_v12 = vld [vmem:[#allocation5 + $0x58] sm:$0xff]  ;;  %v717_v14 = vld [vmem:[#allocation5 + $0x10] sm:$0xff] }
  0x1d   :  { %250 = vmatpush.bf16.msra.mxu0 %v721_v2  ;;  %v735_v13 = vld [vmem:[#allocation7 + $0x20] sm:$0xff]  ;;  %v725_v15 = vld [vmem:[#allocation5 + $0x50] sm:$0xff]  ;;  %v716_v16 = vld [vmem:[#allocation5 + $0x8] sm:$0xff] }
  0x1e   :  { %264 = vmatpush.bf16.msra.mxu1 %v729_v3  ;;  %v724_v17 = vld [vmem:[#allocation5 + $0x48] sm:$0xff]  ;;  %v715_v18 = vld [vmem:[#allocation5] sm:$0xff]  ;;  %v113_v21 = vld [vmem:[#allocation2 + $0x10] sm:$0xff] }
  0x1f   :  { %349 = vmatpush.bf16.msra.mxu2 %v737_v7  ;;  %v723_v19 = vld [vmem:[#allocation5 + $0x40] sm:$0xff]  ;;  %v112_v22 = vld [vmem:[#allocation2 + $0x8] sm:$0xff]  ;;  %v114_v23 = vld [vmem:[#allocation2 + $0x18] sm:$0xff] }
  0x20   :  { %v111_v20 = vld [vmem:[#allocation2] sm:$0xff]  ;;  %v116_v25 = vpack.c.bf16 %v114_v23, %v112_v22  ;;  %v734_v26 = vld [vmem:[#allocation7 + $0x18] sm:$0xff]  ;;  %v733_v27 = vld [vmem:[#allocation7 + $0x10] sm:$0xff] }
  0x21   :  { %251 = vmatpush.bf16.msra.mxu0 %v720_v4  ;;  %v115_v24 = vpack.c.bf16 %v113_v21, %v111_v20  ;;  %v732_v28 = vld [vmem:[#allocation7 + $0x8] sm:$0xff]  ;;  %v731_v29 = vld [vmem:[#allocation7] sm:$0xff]  ;;  %v746_v30 = vld [vmem:[#allocation8 + $0x38] sm:$0xff] }
  0x22   :  { %265 = vmatpush.bf16.msra.mxu1 %v728_v5  ;;  %433 = vmatpush.bf16.msra.mxu3 %v746_v30  ;;  %v745_v31 = vld [vmem:[#allocation8 + $0x30] sm:$0xff]  ;;  %v744_v32 = vld [vmem:[#allocation8 + $0x28] sm:$0xff]  ;;  %v743_v33 = vld [vmem:[#allocation8 + $0x20] sm:$0xff] }
  0x23   :  { %350 = vmatpush.bf16.msra.mxu2 %v736_v10  ;;  %v767_v36 = vld [vmem:[%s1029_s2] ss:$0 sm:$0xff]  ;;  %v742_v46 = vld [vmem:[#allocation8 + $0x18] sm:$0xff]  ;;  %v741_v47 = vld [vmem:[#allocation8 + $0x10] sm:$0xff] }
  0x24   :  { %v740_v48 = vld [vmem:[#allocation8 + $0x8] sm:$0xff]  ;;  %v739_v49 = vld [vmem:[#allocation8] sm:$0xff]  ;;  %v754_v50 = vld [vmem:[#allocation10 + $0x38] sm:$0xff] }
  0x25   :  { %252 = vmatpush.bf16.msra.mxu0 %v719_v8  ;;  %v753_v51 = vld [vmem:[#allocation10 + $0x30] sm:$0xff]  ;;  %v752_v52 = vld [vmem:[#allocation10 + $0x28] sm:$0xff]  ;;  %v751_v53 = vld [vmem:[#allocation10 + $0x20] sm:$0xff] }
  0x26   :  { %266 = vmatpush.bf16.msra.mxu1 %v727_v9  ;;  %434 = vmatpush.bf16.msra.mxu3 %v745_v31  ;;  %v768_v55 = vld [vmem:[%s1031_s4] ss:$0 sm:$0xff]  ;;  %v750_v62 = vld [vmem:[#allocation10 + $0x18] sm:$0xff]  ;;  %v749_v63 = vld [vmem:[#allocation10 + $0x10] sm:$0xff] }
  0x27   :  { %351 = vmatpush.bf16.msra.mxu2 %v735_v13  ;;  %v748_v0 = vld [vmem:[#allocation10 + $0x8] sm:$0xff]  ;;  %v747_v1 = vld [vmem:[#allocation10] sm:$0xff] }
  0x28   :  { %v769_v3 = vld [vmem:[%s1033_s6] ss:$0 sm:$0xff] }
  0x29   :  { %253 = vmatpush.bf16.msra.mxu0 %v718_v11  ;;  %v770_v10 = vld [vmem:[%s1035_s8] ss:$0 sm:$0xff] }
  0x2a   :  { %267 = vmatpush.bf16.msra.mxu1 %v726_v12  ;;  %435 = vmatpush.bf16.msra.mxu3 %v744_v32 }
  0x2b   :  { %352 = vmatpush.bf16.msra.mxu2 %v734_v26 }
  0x2d   :  { %254 = vmatpush.bf16.msra.mxu0 %v717_v14 }
  0x2e   :  { %268 = vmatpush.bf16.msra.mxu1 %v725_v15  ;;  %436 = vmatpush.bf16.msra.mxu3 %v743_v33 }
  0x2f   :  { %353 = vmatpush.bf16.msra.mxu2 %v733_v27 }
  0x31   :  { %255 = vmatpush.bf16.msra.mxu0 %v716_v16 }
  0x32   :  { %269 = vmatpush.bf16.msra.mxu1 %v724_v17  ;;  %437 = vmatpush.bf16.msra.mxu3 %v742_v46 }
  0x33   :  { %354 = vmatpush.bf16.msra.mxu2 %v732_v28 }
  0x35   :  { %256 = vmatpush.bf16.msra.mxu0 %v715_v18 }
  0x36   :  { %270 = vmatpush.bf16.msra.mxu1 %v723_v19  ;;  %438 = vmatpush.bf16.msra.mxu3 %v741_v47 }
  0x37   :  { %355 = vmatpush.bf16.msra.mxu2 %v731_v29 }
  0x38   :  { %257 = vmatmul.bf16.vlgmr.msra.gmra.mxu0 %v115_v24 }
  0x39   :  { %271 = vmatmul.bf16.vlgmr.msra.gmra.mxu1 %v116_v25  ;;  %518 = vmatpush.bf16.msrb.mxu0 %v754_v50 }
  0x3a   :  { %439 = vmatpush.bf16.msra.mxu3 %v740_v48 }
  0x3d   :  { %519 = vmatpush.bf16.msrb.mxu0 %v753_v51 }
  0x3e   :  { %440 = vmatpush.bf16.msra.mxu3 %v739_v49 }
  0x41   :  { %520 = vmatpush.bf16.msrb.mxu0 %v752_v52 }
  0x45   :  { %521 = vmatpush.bf16.msrb.mxu0 %v751_v53 }
  0x49   :  { %522 = vmatpush.bf16.msrb.mxu0 %v750_v62 }
  0x4d   :  { %523 = vmatpush.bf16.msrb.mxu0 %v749_v63 }
  0x51   :  { %524 = vmatpush.bf16.msrb.mxu0 %v748_v0 }
  0x55   :  { %525 = vmatpush.bf16.msrb.mxu0 %v747_v1 }
  0xb5   :  { %v258_v34 = vpop.f32.mrf.mxu0 }
  0xb6   :  { %v272_v35 = vpop.f32.mrf.mxu1  ;;  %v259_v37 = vadd.f32 %v767_v36, %v258_v34 }
  0xb8   :  { %v273_v39 = vadd.f32 %v272_v35, %v259_v37 }
  0xba   :  { %v277_v43 = vmax.f32 %v273_v39, 0.0 }
  0xbd   :  { %v260_v38 = vpop.f32.mrf.mxu0 }
  0xbe   :  { %v261_v40 = vadd.f32 %v767_v36, %v260_v38  ;;  %v274_v41 = vpop.f32.mrf.mxu1 }
  0xc0   :  { %v275_v42 = vadd.f32 %v274_v41, %v261_v40 }
  0xc2   :  { %v278_v44 = vmax.f32 %v275_v42, 0.0 }
  0xc4   :  { %v279_v45 = vpack.c.bf16 %v278_v44, %v277_v43 }
  0xc6   :  { %356 = vmatmul.bf16.vlgmr.msra.gmra.mxu2 %v279_v45 }
 0x149   :  { %v357_v54 = vpop.f32.mrf.mxu2 }
 0x14a   :  { %v358_v56 = vadd.f32 %v768_v55, %v357_v54 }
 0x14c   :  { %v362_v59 = vmax.f32 %v358_v56, 0.0 }
 0x151   :  { %v359_v57 = vpop.f32.mrf.mxu2 }
 0x152   :  { %v360_v58 = vadd.f32 %v768_v55, %v359_v57 }
 0x154   :  { %v363_v60 = vmax.f32 %v360_v58, 0.0 }
 0x156   :  { %v364_v61 = vpack.c.bf16 %v363_v60, %v362_v59 }
 0x158   :  { %441 = vmatmul.bf16.vlgmr.msra.gmra.mxu3 %v364_v61 }
 0x1db   :  { %v442_v2 = vpop.f32.mrf.mxu3 }
 0x1dc   :  { %v443_v4 = vadd.f32 %v769_v3, %v442_v2 }
 0x1de   :  { %v447_v7 = vmax.f32 %v443_v4, 0.0 }
 0x1e3   :  { %v444_v5 = vpop.f32.mrf.mxu3 }
 0x1e4   :  { %v445_v6 = vadd.f32 %v769_v3, %v444_v5 }
 0x1e6   :  { %v448_v8 = vmax.f32 %v445_v6, 0.0 }
 0x1e8   :  { %v449_v9 = vpack.c.bf16 %v448_v8, %v447_v7 }
 0x1ea   :  { %526 = vmatmul.bf16.vlgmr.msrb.gmra.mxu0 %v449_v9 }
 0x267   :  { %v527_v11 = vpop.f32.mrf.mxu0 }
 0x268   :  { %v528_v12 = vadd.f32 %v770_v10, %v527_v11 }
 0x26a   :  { %532 = vst [vmem:[#allocation11] sm:$0xff] %v528_v12 }
 0x26f   :  { %v529_v13 = vpop.f32.mrf.mxu0 }
 0x270   :  { %v530_v14 = vadd.f32 %v770_v10, %v529_v13 }
 0x272   :  { %533 = vst [vmem:[#allocation11 + $0x8] sm:$0xff] %v530_v14 }
 0x273   :  { %537 = vsyncadd [#allocation4], 128  ;;  %s540_s19 = sshll.u32 %s1036_s9, 4  ;;  %s932_s20 = smov [#allocation11]   ;;  %s541_s19 = int_to_ptr.hbm [resolvable:$true] %s540_s19 }
 0x274   :  { %s538_s21 = sshll.u32 %s932_s20, 4  ;;  %s933_s1 = smov 128   ;;  %s539_s21 = int_to_ptr.vmem [resolvable:$true] %s538_s21 }
 0x275   :  { %s934_s22 = smov 8  }
 0x276   :  { %546 = dma.vmem_to_hbm [thread:$0]  %s539_s21, 128, %s541_s19, [#allocation4], %s933_s1, %s933_s1, %s934_s22  }
 0x277   :  { %921 = dma.done.wait [#allocation4], 256  }
 0x278   :  { %922 = vsyncadd [#allocation4], 4294967040 }
 0x279   :  { %551 = vsyncpa [#allocation3], 1 }
 0x27a   :  { %552 = vsyncpa [#allocation6], 1 }
 0x27b   :  { %553 = vsyncpa [#allocation9], 1 }
 0x27c   :  { %554 = vsyncpa [#allocation4], 1 }

</bundles_post_ra>
